<compile_context>
chip_gen: v6e
topology: v6e:2x2x1
jax: 0.10.0
libtpu: 0.0.40
codegen_flags: <defaults>
</compile_context>

<pallas_src>
import functools
import math

import jax
import jax.numpy as jnp
from jax import lax
from jax.experimental import pallas as pl
from jax.experimental.pallas import tpu as pltpu


def _self_attention_kernel(
    x_ref,        # (rows, D)      activations (rows = batch_block * N)
    wqkv_ref,     # (D, 3H)        fused [Q|K|V] weights (Q pre-scaled by 1/sqrt(hd))
    bqkv_ref,     # (1, 3H)        fused biases (bq pre-scaled)
    wd_ref,       # (nh, hd, H)    dense weight, split per head host-side
    bd_ref,       # (1, H)
    lnw_ref,      # (1, H)
    lnb_ref,      # (1, H)
    out_ref,      # (rows, H)
    *,
    batch_block: int,
    seq_len: int,
    num_heads: int,
    head_size: int,
    eps: float,
    matmul_dtype,
):
    H = num_heads * head_size
    N = seq_len
    bb = batch_block
    rows = bb * N

    x = x_ref[...]                                            # matmul_dtype

    # Fused Q|K|V projection: one wide MXU matmul (3H output columns), f32 acc.
    qkv = jnp.dot(x, wqkv_ref[...], preferred_element_type=jnp.float32)
    qkv = jnp.maximum(qkv + bqkv_ref[...], 0.0)               # (rows, 3H) f32

    # Single sublane->leading split; afterwards every per-head access is a
    # cheap static lane slice (no per-batch loop, no stacks, no lane concats).
    qkv3 = qkv.reshape(bb, N, 3 * H)                          # (bb, N, 3H)

    hidden = None                                             # (rows, H) f32 accumulator
    for h in range(num_heads):                                # static, small unroll
        lo = h * head_size
        q_h = qkv3[:, :, lo:lo + head_size]                   # (bb, N, hd)
        k_h = qkv3[:, :, H + lo:H + lo + head_size]
        v_h = qkv3[:, :, 2 * H + lo:2 * H + lo + head_size]

        # Scores: the 1/sqrt(hd) scale is already folded into the Q weights.
        s = jnp.einsum("bqd,bkd->bqk",
                       q_h.astype(matmul_dtype), k_h.astype(matmul_dtype),
                       preferred_element_type=jnp.float32)    # (bb, N, N) f32

        # Numerically stable softmax; reciprocal on the EUP (+1 Newton step)
        # keeps the divide off the VALU.
        s = s - jnp.max(s, axis=-1, keepdims=True)
        p = jnp.exp(s)
        denom = jnp.sum(p, axis=-1, keepdims=True)
        r = pl.reciprocal(denom, approx=True)
        r = r * (2.0 - denom * r)
        p = p * r
        # attn_dropout: identity in eval mode.

        ctx_h = jnp.einsum("bqk,bkd->bqd",
                           p.astype(matmul_dtype), v_h.astype(matmul_dtype),
                           preferred_element_type=jnp.float32)  # (bb, N, hd) f32

        # Head-merge fused into the output projection: this head's (hd, H)
        # slice of wd accumulates straight into the lane-dense hidden slab.
        contrib = jnp.dot(ctx_h.reshape(rows, head_size).astype(matmul_dtype),
                          wd_ref[h],
                          preferred_element_type=jnp.float32)   # (rows, H)
        hidden = contrib if hidden is None else hidden + contrib

    hidden = hidden + bd_ref[...]
    # out_dropout: identity in eval mode.

    # LayerNorm (TF style: eps inside the sqrt, biased variance); rsqrt on EUP.
    u = jnp.mean(hidden, axis=-1, keepdims=True)
    xc = hidden - u
    var = jnp.mean(xc * xc, axis=-1, keepdims=True)
    normed = xc * lax.rsqrt(var + eps)
    out = lnw_ref[...] * normed + lnb_ref[...]

    out_ref[...] = out.astype(out_ref.dtype)                  # single contiguous store


def _default_batch_block(B, N, target_rows):
    """Largest divisor of B whose row block (<= target_rows) keeps layout legal."""
    divisors = [d for d in range(1, B + 1) if B % d == 0]
    legal = [d for d in divisors if d == B or (d * N) % 8 == 0]
    under = [d for d in legal if d * N <= target_rows]
    return max(under) if under else min(legal)


def self_attention_forward(x, params, *, num_heads, eps=1e-12,
                           batch_block=None, matmul_dtype=jnp.float32,
                           target_rows=1024):
    """x: (B, N, input_size) -> (B, N, hidden_size). eps=1e-12 matches the module."""
    B, N, D = x.shape
    H = params["wq"].shape[1]
    assert H % num_heads == 0
    head_size = H // num_heads

    # Rows-per-step ~ target_rows so the activation DMA / output writeback are
    # pipelined behind compute.  On v7x pass batch_block <= B//2 explicitly so
    # both TensorCores get grid steps.
    if batch_block is None:
        batch_block = _default_batch_block(B, N, target_rows)
    assert B % batch_block == 0, "batch_block must divide batch"
    num_steps = B // batch_block
    rows = batch_block * N
    if num_steps > 1:
        assert rows % 8 == 0, "batch_block * N must be a multiple of 8 when tiling"

    # Host-side (free) parameter fusion / pre-scaling.
    scale = 1.0 / math.sqrt(head_size)
    wqkv = jnp.concatenate([params["wq"] * scale, params["wk"], params["wv"]],
                           axis=1).astype(matmul_dtype)                  # (D, 3H)
    bqkv = jnp.concatenate([params["bq"] * scale, params["bk"], params["bv"]],
                           axis=1).astype(jnp.float32)                   # (1, 3H)
    wd_heads = params["wd"].reshape(num_heads, head_size, H).astype(matmul_dtype)

    x2d = x.reshape(B * N, D).astype(matmul_dtype)

    kernel = functools.partial(
        _self_attention_kernel,
        batch_block=batch_block, seq_len=N, num_heads=num_heads,
        head_size=head_size, eps=eps, matmul_dtype=matmul_dtype)

    def const(shape):
        return pl.BlockSpec(shape, lambda i, _s=len(shape): (0,) * _s)

    nh = num_heads
    flops = (2 * B * N * D * 3 * H                    # fused QKV projection
             + 2 * 2 * B * nh * N * N * head_size     # scores + context
             + 2 * B * N * H * H)                     # output dense
    bytes_accessed = (x2d.size * x2d.dtype.itemsize
                      + wqkv.size * wqkv.dtype.itemsize
                      + wd_heads.size * wd_heads.dtype.itemsize
                      + B * N * H * 4)
    cost = pl.CostEstimate(flops=int(flops),
                           transcendentals=int(B * nh * N * N + 2 * B * N),
                           bytes_accessed=int(bytes_accessed))

    # Per-step VMEM budget: double-buffered x / out blocks + resident weights +
    # the (rows, 3H) qkv intermediate; clamp into [32 MiB, 64 MiB] so the limit
    # is valid on v7x (64 MiB physical) while unlocking bigger tiles elsewhere.
    xb = jnp.dtype(matmul_dtype).itemsize
    need = (2 * rows * D * xb + 2 * rows * H * 4
            + (D * 3 * H + H * H) * xb + 4 * rows * 3 * H * 4)
    vmem_limit = int(min(64 * 1024 * 1024, max(32 * 1024 * 1024, 2 * need)))

    out2d = pl.pallas_call(
        kernel,
        out_shape=jax.ShapeDtypeStruct((B * N, H), jnp.float32),
        grid_spec=pltpu.PrefetchScalarGridSpec(
            num_scalar_prefetch=0,
            grid=(num_steps,),
            in_specs=[
                pl.BlockSpec((rows, D), lambda i: (i, 0)),   # activations (pipelined)
                const((D, 3 * H)),                           # fused QKV weight
                const((1, 3 * H)),                           # fused QKV bias
                const((num_heads, head_size, H)),            # per-head dense weight
                const((1, H)),                               # dense bias
                const((1, H)), const((1, H)),                # layernorm weight / bias
            ],
            out_specs=pl.BlockSpec((rows, H), lambda i: (i, 0)),
        ),
        compiler_params=pltpu.CompilerParams(
            dimension_semantics=("parallel",),
            vmem_limit_bytes=vmem_limit),
        cost_estimate=cost,
    )(x2d, wqkv, bqkv, wd_heads, params["bd"], params["ln_w"], params["ln_b"])

    return out2d.reshape(B, N, H)


def _xavier_uniform(key, fan_in, fan_out):
    bound = math.sqrt(6.0 / (fan_in + fan_out))
    return jax.random.uniform(key, (fan_in, fan_out), jnp.float32, -bound, bound)


def init_params(key, input_size, hidden_size):
    k = jax.random.split(key, 4)
    return {
        "wq": _xavier_uniform(k[0], input_size, hidden_size),
        "bq": jnp.zeros((1, hidden_size), jnp.float32),
        "wk": _xavier_uniform(k[1], input_size, hidden_size),
        "bk": jnp.zeros((1, hidden_size), jnp.float32),
        "wv": _xavier_uniform(k[2], input_size, hidden_size),
        "bv": jnp.zeros((1, hidden_size), jnp.float32),
        "wd": _xavier_uniform(k[3], hidden_size, hidden_size),
        "bd": jnp.zeros((1, hidden_size), jnp.float32),
        "ln_w": jnp.ones((1, hidden_size), jnp.float32),
        "ln_b": jnp.zeros((1, hidden_size), jnp.float32),
    }


def reference_forward(x, params, *, num_heads, eps=1e-12):
    """Pure-JAX reference mirroring the PyTorch forward (eval mode)."""
    B, N, D = x.shape
    H = params["wq"].shape[1]
    hd = H // num_heads

    q = jax.nn.relu(x @ params["wq"] + params["bq"])
    k = jax.nn.relu(x @ params["wk"] + params["bk"])
    v = jax.nn.relu(x @ params["wv"] + params["bv"])

    def split_heads(t):
        return t.reshape(B, N, num_heads, hd).transpose(0, 2, 1, 3)

    qh, kh, vh = split_heads(q), split_heads(k), split_heads(v)
    scores = jnp.einsum("bhqd,bhkd->bhqk", qh, kh) / math.sqrt(hd)
    probs = jax.nn.softmax(scores, axis=-1)
    ctx = jnp.einsum("bhqk,bhkd->bhqd", probs, vh)
    ctx = ctx.transpose(0, 2, 1, 3).reshape(B, N, H)

    hidden = ctx @ params["wd"] + params["bd"]
    u = hidden.mean(-1, keepdims=True)
    var = ((hidden - u) ** 2).mean(-1, keepdims=True)
    normed = (hidden - u) / jnp.sqrt(var + eps)
    return params["ln_w"] * normed + params["ln_b"]


if __name__ == "__main__":
    # Small shapes consistent with the module's forward:
    # input (batch, n, input_size), output (batch, n, hidden_size)
    batch, n, input_size, hidden_size, num_heads = 2, 8, 32, 32, 4

    key = jax.random.PRNGKey(0)
    k_x, k_p = jax.random.split(key)
    x = jax.random.normal(k_x, (batch, n, input_size), jnp.float32)
    params = init_params(k_p, input_size, hidden_size)

    # f32 run (whole batch in one pipelined-grid step at these tiny shapes),
    # tight tolerance vs. the pure-JAX reference.
    out = self_attention_forward(x, params, num_heads=num_heads)
    out = jax.block_until_ready(out)
    ref = reference_forward(x, params, num_heads=num_heads)
    assert out.shape == (batch, n, hidden_size)
    assert jnp.allclose(out, ref, atol=1e-3, rtol=1e-3), "f32 kernel mismatch vs reference"

    # bf16-MXU run with 2 grid steps (exercises the tiled/pipelined path and the
    # bf16 operand feed); tolerance relaxed for bf16 matmul operands.
    out_bf16 = self_attention_forward(x, params, num_heads=num_heads,
                                      batch_block=1, matmul_dtype=jnp.bfloat16)
    out_bf16 = jax.block_until_ready(out_bf16)
    assert out_bf16.shape == (batch, n, hidden_size)
    assert bool(jnp.all(jnp.isfinite(out_bf16)))
    assert float(jnp.max(jnp.abs(out_bf16 - ref))) < 0.25, "bf16 kernel grossly off"

    print("KERNEL_OK")
</pallas_src>

<mosaic_0001>
module attributes {stable_mosaic.version = 11 : i64} {
  func.func @_self_attention_kernel(%arg0: i32, %arg1: memref<16x32xf32, #tpu.memory_space<vmem>>, %arg2: memref<32x96xf32, #tpu.memory_space<vmem>>, %arg3: memref<1x96xf32, #tpu.memory_space<vmem>>, %arg4: memref<4x8x32xf32, #tpu.memory_space<vmem>>, %arg5: memref<1x32xf32, #tpu.memory_space<vmem>>, %arg6: memref<1x32xf32, #tpu.memory_space<vmem>>, %arg7: memref<1x32xf32, #tpu.memory_space<vmem>>, %arg8: memref<16x32xf32, #tpu.memory_space<vmem>>) attributes {dimension_semantics = [#tpu.dimension_semantics<parallel>], iteration_bounds = array<i64: 1>, scalar_prefetch = 0 : i64, scratch_operands = 0 : i64, tpu.core_type = #tpu.core_type<tc>, window_params = [{transform_indices = @transform_0, window_bounds = array<i64: 16, 32>}, {pipeline_mode = #tpu.pipeline_mode<synchronous>, transform_indices = @transform_1, window_bounds = array<i64: 32, 96>}, {pipeline_mode = #tpu.pipeline_mode<synchronous>, transform_indices = @transform_2, window_bounds = array<i64: 1, 96>}, {pipeline_mode = #tpu.pipeline_mode<synchronous>, transform_indices = @transform_3, window_bounds = array<i64: 4, 8, 32>}, {pipeline_mode = #tpu.pipeline_mode<synchronous>, transform_indices = @transform_4, window_bounds = array<i64: 1, 32>}, {pipeline_mode = #tpu.pipeline_mode<synchronous>, transform_indices = @transform_5, window_bounds = array<i64: 1, 32>}, {pipeline_mode = #tpu.pipeline_mode<synchronous>, transform_indices = @transform_6, window_bounds = array<i64: 1, 32>}, {transform_indices = @transform_7, window_bounds = array<i64: 16, 32>}]} {
    %c0 = arith.constant 0 : index
    %c0_0 = arith.constant 0 : index
    %0 = vector.load %arg1[%c0, %c0_0] : memref<16x32xf32, #tpu.memory_space<vmem>>, vector<16x32xf32>
    %c0_1 = arith.constant 0 : index
    %c0_2 = arith.constant 0 : index
    %1 = vector.load %arg2[%c0_1, %c0_2] : memref<32x96xf32, #tpu.memory_space<vmem>>, vector<32x96xf32>
    %cst = arith.constant dense<0.000000e+00> : vector<16x96xf32>
    %2 = tpu.matmul %0, %1, %cst {dimension_numbers = #tpu.dot_dimension_numbers<[1], [0], [0], [1], [0, 0, 1, 1], [], []>} : vector<16x32xf32>, vector<32x96xf32>, vector<16x96xf32> -> vector<16x96xf32>
    %c0_3 = arith.constant 0 : index
    %c0_4 = arith.constant 0 : index
    %3 = vector.load %arg3[%c0_3, %c0_4] : memref<1x96xf32, #tpu.memory_space<vmem>>, vector<1x96xf32>
    %4 = vector.broadcast %3 : vector<1x96xf32> to vector<16x96xf32>
    %5 = arith.addf %2, %4 : vector<16x96xf32>
    %cst_5 = arith.constant 0.000000e+00 : f32
    %6 = vector.broadcast %cst_5 : f32 to vector<16x96xf32>
    %7 = arith.maximumf %5, %6 : vector<16x96xf32>
    %8 = vector.shape_cast %7 : vector<16x96xf32> to vector<2x8x96xf32>
    %9 = vector.extract_strided_slice %8 {offsets = [0, 0, 0], sizes = [2, 8, 8], strides = [1, 1, 1]} : vector<2x8x96xf32> to vector<2x8x8xf32>
    %10 = vector.extract_strided_slice %8 {offsets = [0, 0, 32], sizes = [2, 8, 8], strides = [1, 1, 1]} : vector<2x8x96xf32> to vector<2x8x8xf32>
    %11 = vector.extract_strided_slice %8 {offsets = [0, 0, 64], sizes = [2, 8, 8], strides = [1, 1, 1]} : vector<2x8x96xf32> to vector<2x8x8xf32>
    "tpu.trace_start"() <{level = 10 : i32, message = "bqd,bkd->bqk"}> : () -> ()
    %cst_6 = arith.constant dense<0.000000e+00> : vector<2x8x8xf32>
    %12 = tpu.matmul %9, %10, %cst_6 {dimension_numbers = #tpu.dot_dimension_numbers<[2], [2], [1], [1], [0, 0, 0, 1, 1, 1], [0], [0]>} : vector<2x8x8xf32>, vector<2x8x8xf32>, vector<2x8x8xf32> -> vector<2x8x8xf32>
    "tpu.trace_stop"() : () -> ()
    %cst_7 = arith.constant dense<0xFF800000> : vector<2x8xf32>
    %13 = vector.multi_reduction <maximumf>, %12, %cst_7 [2] : vector<2x8x8xf32> to vector<2x8xf32>
    %14 = vector.shape_cast %13 : vector<2x8xf32> to vector<2x8x1xf32>
    %15 = vector.broadcast %14 : vector<2x8x1xf32> to vector<2x8x8xf32>
    %16 = arith.subf %12, %15 : vector<2x8x8xf32>
    %17 = math.exp %16 : vector<2x8x8xf32>
    %cst_8 = arith.constant dense<0.000000e+00> : vector<2x8xf32>
    %18 = vector.multi_reduction <add>, %17, %cst_8 [2] : vector<2x8x8xf32> to vector<2x8xf32>
    %19 = vector.shape_cast %18 : vector<2x8xf32> to vector<2x8x1xf32>
    %20 = tpu.reciprocal %19 {approx = true} : vector<2x8x1xf32> -> vector<2x8x1xf32>
    %21 = arith.mulf %19, %20 : vector<2x8x1xf32>
    %cst_9 = arith.constant 2.000000e+00 : f32
    %22 = vector.broadcast %cst_9 : f32 to vector<2x8x1xf32>
    %23 = arith.subf %22, %21 : vector<2x8x1xf32>
    %24 = arith.mulf %20, %23 : vector<2x8x1xf32>
    %25 = vector.broadcast %24 : vector<2x8x1xf32> to vector<2x8x8xf32>
    %26 = arith.mulf %17, %25 : vector<2x8x8xf32>
    "tpu.trace_start"() <{level = 10 : i32, message = "bqk,bkd->bqd"}> : () -> ()
    %cst_10 = arith.constant dense<0.000000e+00> : vector<2x8x8xf32>
    %27 = tpu.matmul %26, %11, %cst_10 {dimension_numbers = #tpu.dot_dimension_numbers<[2], [1], [1], [2], [0, 0, 0, 1, 1, 2], [0], [0]>} : vector<2x8x8xf32>, vector<2x8x8xf32>, vector<2x8x8xf32> -> vector<2x8x8xf32>
    "tpu.trace_stop"() : () -> ()
    %28 = vector.shape_cast %27 : vector<2x8x8xf32> to vector<16x8xf32>
    %c0_11 = arith.constant 0 : index
    %c0_12 = arith.constant 0 : index
    %c0_13 = arith.constant 0 : index
    %29 = vector.load %arg4[%c0_11, %c0_12, %c0_13] : memref<4x8x32xf32, #tpu.memory_space<vmem>>, vector<1x8x32xf32>
    %30 = vector.shape_cast %29 : vector<1x8x32xf32> to vector<8x32xf32>
    %cst_14 = arith.constant dense<0.000000e+00> : vector<16x32xf32>
    %31 = tpu.matmul %28, %30, %cst_14 {dimension_numbers = #tpu.dot_dimension_numbers<[1], [0], [0], [1], [0, 0, 1, 1], [], []>} : vector<16x8xf32>, vector<8x32xf32>, vector<16x32xf32> -> vector<16x32xf32>
    %32 = vector.extract_strided_slice %8 {offsets = [0, 0, 8], sizes = [2, 8, 8], strides = [1, 1, 1]} : vector<2x8x96xf32> to vector<2x8x8xf32>
    %33 = vector.extract_strided_slice %8 {offsets = [0, 0, 40], sizes = [2, 8, 8], strides = [1, 1, 1]} : vector<2x8x96xf32> to vector<2x8x8xf32>
    %34 = vector.extract_strided_slice %8 {offsets = [0, 0, 72], sizes = [2, 8, 8], strides = [1, 1, 1]} : vector<2x8x96xf32> to vector<2x8x8xf32>
    "tpu.trace_start"() <{level = 10 : i32, message = "bqd,bkd->bqk"}> : () -> ()
    %cst_15 = arith.constant dense<0.000000e+00> : vector<2x8x8xf32>
    %35 = tpu.matmul %32, %33, %cst_15 {dimension_numbers = #tpu.dot_dimension_numbers<[2], [2], [1], [1], [0, 0, 0, 1, 1, 1], [0], [0]>} : vector<2x8x8xf32>, vector<2x8x8xf32>, vector<2x8x8xf32> -> vector<2x8x8xf32>
    "tpu.trace_stop"() : () -> ()
    %cst_16 = arith.constant dense<0xFF800000> : vector<2x8xf32>
    %36 = vector.multi_reduction <maximumf>, %35, %cst_16 [2] : vector<2x8x8xf32> to vector<2x8xf32>
    %37 = vector.shape_cast %36 : vector<2x8xf32> to vector<2x8x1xf32>
    %38 = vector.broadcast %37 : vector<2x8x1xf32> to vector<2x8x8xf32>
    %39 = arith.subf %35, %38 : vector<2x8x8xf32>
    %40 = math.exp %39 : vector<2x8x8xf32>
    %cst_17 = arith.constant dense<0.000000e+00> : vector<2x8xf32>
    %41 = vector.multi_reduction <add>, %40, %cst_17 [2] : vector<2x8x8xf32> to vector<2x8xf32>
    %42 = vector.shape_cast %41 : vector<2x8xf32> to vector<2x8x1xf32>
    %43 = tpu.reciprocal %42 {approx = true} : vector<2x8x1xf32> -> vector<2x8x1xf32>
    %44 = arith.mulf %42, %43 : vector<2x8x1xf32>
    %cst_18 = arith.constant 2.000000e+00 : f32
    %45 = vector.broadcast %cst_18 : f32 to vector<2x8x1xf32>
    %46 = arith.subf %45, %44 : vector<2x8x1xf32>
    %47 = arith.mulf %43, %46 : vector<2x8x1xf32>
    %48 = vector.broadcast %47 : vector<2x8x1xf32> to vector<2x8x8xf32>
    %49 = arith.mulf %40, %48 : vector<2x8x8xf32>
    "tpu.trace_start"() <{level = 10 : i32, message = "bqk,bkd->bqd"}> : () -> ()
    %cst_19 = arith.constant dense<0.000000e+00> : vector<2x8x8xf32>
    %50 = tpu.matmul %49, %34, %cst_19 {dimension_numbers = #tpu.dot_dimension_numbers<[2], [1], [1], [2], [0, 0, 0, 1, 1, 2], [0], [0]>} : vector<2x8x8xf32>, vector<2x8x8xf32>, vector<2x8x8xf32> -> vector<2x8x8xf32>
    "tpu.trace_stop"() : () -> ()
    %51 = vector.shape_cast %50 : vector<2x8x8xf32> to vector<16x8xf32>
    %c1 = arith.constant 1 : index
    %c0_20 = arith.constant 0 : index
    %c0_21 = arith.constant 0 : index
    %52 = vector.load %arg4[%c1, %c0_20, %c0_21] : memref<4x8x32xf32, #tpu.memory_space<vmem>>, vector<1x8x32xf32>
    %53 = vector.shape_cast %52 : vector<1x8x32xf32> to vector<8x32xf32>
    %cst_22 = arith.constant dense<0.000000e+00> : vector<16x32xf32>
    %54 = tpu.matmul %51, %53, %cst_22 {dimension_numbers = #tpu.dot_dimension_numbers<[1], [0], [0], [1], [0, 0, 1, 1], [], []>} : vector<16x8xf32>, vector<8x32xf32>, vector<16x32xf32> -> vector<16x32xf32>
    %55 = arith.addf %31, %54 : vector<16x32xf32>
    %56 = vector.extract_strided_slice %8 {offsets = [0, 0, 16], sizes = [2, 8, 8], strides = [1, 1, 1]} : vector<2x8x96xf32> to vector<2x8x8xf32>
    %57 = vector.extract_strided_slice %8 {offsets = [0, 0, 48], sizes = [2, 8, 8], strides = [1, 1, 1]} : vector<2x8x96xf32> to vector<2x8x8xf32>
    %58 = vector.extract_strided_slice %8 {offsets = [0, 0, 80], sizes = [2, 8, 8], strides = [1, 1, 1]} : vector<2x8x96xf32> to vector<2x8x8xf32>
    "tpu.trace_start"() <{level = 10 : i32, message = "bqd,bkd->bqk"}> : () -> ()
    %cst_23 = arith.constant dense<0.000000e+00> : vector<2x8x8xf32>
    %59 = tpu.matmul %56, %57, %cst_23 {dimension_numbers = #tpu.dot_dimension_numbers<[2], [2], [1], [1], [0, 0, 0, 1, 1, 1], [0], [0]>} : vector<2x8x8xf32>, vector<2x8x8xf32>, vector<2x8x8xf32> -> vector<2x8x8xf32>
    "tpu.trace_stop"() : () -> ()
    %cst_24 = arith.constant dense<0xFF800000> : vector<2x8xf32>
    %60 = vector.multi_reduction <maximumf>, %59, %cst_24 [2] : vector<2x8x8xf32> to vector<2x8xf32>
    %61 = vector.shape_cast %60 : vector<2x8xf32> to vector<2x8x1xf32>
    %62 = vector.broadcast %61 : vector<2x8x1xf32> to vector<2x8x8xf32>
    %63 = arith.subf %59, %62 : vector<2x8x8xf32>
    %64 = math.exp %63 : vector<2x8x8xf32>
    %cst_25 = arith.constant dense<0.000000e+00> : vector<2x8xf32>
    %65 = vector.multi_reduction <add>, %64, %cst_25 [2] : vector<2x8x8xf32> to vector<2x8xf32>
    %66 = vector.shape_cast %65 : vector<2x8xf32> to vector<2x8x1xf32>
    %67 = tpu.reciprocal %66 {approx = true} : vector<2x8x1xf32> -> vector<2x8x1xf32>
    %68 = arith.mulf %66, %67 : vector<2x8x1xf32>
    %cst_26 = arith.constant 2.000000e+00 : f32
    %69 = vector.broadcast %cst_26 : f32 to vector<2x8x1xf32>
    %70 = arith.subf %69, %68 : vector<2x8x1xf32>
    %71 = arith.mulf %67, %70 : vector<2x8x1xf32>
    %72 = vector.broadcast %71 : vector<2x8x1xf32> to vector<2x8x8xf32>
    %73 = arith.mulf %64, %72 : vector<2x8x8xf32>
    "tpu.trace_start"() <{level = 10 : i32, message = "bqk,bkd->bqd"}> : () -> ()
    %cst_27 = arith.constant dense<0.000000e+00> : vector<2x8x8xf32>
    %74 = tpu.matmul %73, %58, %cst_27 {dimension_numbers = #tpu.dot_dimension_numbers<[2], [1], [1], [2], [0, 0, 0, 1, 1, 2], [0], [0]>} : vector<2x8x8xf32>, vector<2x8x8xf32>, vector<2x8x8xf32> -> vector<2x8x8xf32>
    "tpu.trace_stop"() : () -> ()
    %75 = vector.shape_cast %74 : vector<2x8x8xf32> to vector<16x8xf32>
    %c2 = arith.constant 2 : index
    %c0_28 = arith.constant 0 : index
    %c0_29 = arith.constant 0 : index
    %76 = vector.load %arg4[%c2, %c0_28, %c0_29] : memref<4x8x32xf32, #tpu.memory_space<vmem>>, vector<1x8x32xf32>
    %77 = vector.shape_cast %76 : vector<1x8x32xf32> to vector<8x32xf32>
    %cst_30 = arith.constant dense<0.000000e+00> : vector<16x32xf32>
    %78 = tpu.matmul %75, %77, %cst_30 {dimension_numbers = #tpu.dot_dimension_numbers<[1], [0], [0], [1], [0, 0, 1, 1], [], []>} : vector<16x8xf32>, vector<8x32xf32>, vector<16x32xf32> -> vector<16x32xf32>
    %79 = arith.addf %55, %78 : vector<16x32xf32>
    %80 = vector.extract_strided_slice %8 {offsets = [0, 0, 24], sizes = [2, 8, 8], strides = [1, 1, 1]} : vector<2x8x96xf32> to vector<2x8x8xf32>
    %81 = vector.extract_strided_slice %8 {offsets = [0, 0, 56], sizes = [2, 8, 8], strides = [1, 1, 1]} : vector<2x8x96xf32> to vector<2x8x8xf32>
    %82 = vector.extract_strided_slice %8 {offsets = [0, 0, 88], sizes = [2, 8, 8], strides = [1, 1, 1]} : vector<2x8x96xf32> to vector<2x8x8xf32>
    "tpu.trace_start"() <{level = 10 : i32, message = "bqd,bkd->bqk"}> : () -> ()
    %cst_31 = arith.constant dense<0.000000e+00> : vector<2x8x8xf32>
    %83 = tpu.matmul %80, %81, %cst_31 {dimension_numbers = #tpu.dot_dimension_numbers<[2], [2], [1], [1], [0, 0, 0, 1, 1, 1], [0], [0]>} : vector<2x8x8xf32>, vector<2x8x8xf32>, vector<2x8x8xf32> -> vector<2x8x8xf32>
    "tpu.trace_stop"() : () -> ()
    %cst_32 = arith.constant dense<0xFF800000> : vector<2x8xf32>
    %84 = vector.multi_reduction <maximumf>, %83, %cst_32 [2] : vector<2x8x8xf32> to vector<2x8xf32>
    %85 = vector.shape_cast %84 : vector<2x8xf32> to vector<2x8x1xf32>
    %86 = vector.broadcast %85 : vector<2x8x1xf32> to vector<2x8x8xf32>
    %87 = arith.subf %83, %86 : vector<2x8x8xf32>
    %88 = math.exp %87 : vector<2x8x8xf32>
    %cst_33 = arith.constant dense<0.000000e+00> : vector<2x8xf32>
    %89 = vector.multi_reduction <add>, %88, %cst_33 [2] : vector<2x8x8xf32> to vector<2x8xf32>
    %90 = vector.shape_cast %89 : vector<2x8xf32> to vector<2x8x1xf32>
    %91 = tpu.reciprocal %90 {approx = true} : vector<2x8x1xf32> -> vector<2x8x1xf32>
    %92 = arith.mulf %90, %91 : vector<2x8x1xf32>
    %cst_34 = arith.constant 2.000000e+00 : f32
    %93 = vector.broadcast %cst_34 : f32 to vector<2x8x1xf32>
    %94 = arith.subf %93, %92 : vector<2x8x1xf32>
    %95 = arith.mulf %91, %94 : vector<2x8x1xf32>
    %96 = vector.broadcast %95 : vector<2x8x1xf32> to vector<2x8x8xf32>
    %97 = arith.mulf %88, %96 : vector<2x8x8xf32>
    "tpu.trace_start"() <{level = 10 : i32, message = "bqk,bkd->bqd"}> : () -> ()
    %cst_35 = arith.constant dense<0.000000e+00> : vector<2x8x8xf32>
    %98 = tpu.matmul %97, %82, %cst_35 {dimension_numbers = #tpu.dot_dimension_numbers<[2], [1], [1], [2], [0, 0, 0, 1, 1, 2], [0], [0]>} : vector<2x8x8xf32>, vector<2x8x8xf32>, vector<2x8x8xf32> -> vector<2x8x8xf32>
    "tpu.trace_stop"() : () -> ()
    %99 = vector.shape_cast %98 : vector<2x8x8xf32> to vector<16x8xf32>
    %c3 = arith.constant 3 : index
    %c0_36 = arith.constant 0 : index
    %c0_37 = arith.constant 0 : index
    %100 = vector.load %arg4[%c3, %c0_36, %c0_37] : memref<4x8x32xf32, #tpu.memory_space<vmem>>, vector<1x8x32xf32>
    %101 = vector.shape_cast %100 : vector<1x8x32xf32> to vector<8x32xf32>
    %cst_38 = arith.constant dense<0.000000e+00> : vector<16x32xf32>
    %102 = tpu.matmul %99, %101, %cst_38 {dimension_numbers = #tpu.dot_dimension_numbers<[1], [0], [0], [1], [0, 0, 1, 1], [], []>} : vector<16x8xf32>, vector<8x32xf32>, vector<16x32xf32> -> vector<16x32xf32>
    %103 = arith.addf %79, %102 : vector<16x32xf32>
    %c0_39 = arith.constant 0 : index
    %c0_40 = arith.constant 0 : index
    %104 = vector.load %arg5[%c0_39, %c0_40] : memref<1x32xf32, #tpu.memory_space<vmem>>, vector<1x32xf32>
    %105 = vector.broadcast %104 : vector<1x32xf32> to vector<16x32xf32>
    %106 = arith.addf %103, %105 : vector<16x32xf32>
    %cst_41 = arith.constant dense<0.000000e+00> : vector<16xf32>
    %107 = vector.multi_reduction <add>, %106, %cst_41 [1] : vector<16x32xf32> to vector<16xf32>
    %108 = vector.shape_cast %107 : vector<16xf32> to vector<16x1xf32>
    %cst_42 = arith.constant 3.200000e+01 : f32
    %109 = vector.broadcast %cst_42 : f32 to vector<16x1xf32>
    %110 = arith.divf %108, %109 : vector<16x1xf32>
    %111 = vector.broadcast %110 : vector<16x1xf32> to vector<16x32xf32>
    %112 = arith.subf %106, %111 : vector<16x32xf32>
    %113 = arith.mulf %112, %112 : vector<16x32xf32>
    %cst_43 = arith.constant dense<0.000000e+00> : vector<16xf32>
    %114 = vector.multi_reduction <add>, %113, %cst_43 [1] : vector<16x32xf32> to vector<16xf32>
    %115 = vector.shape_cast %114 : vector<16xf32> to vector<16x1xf32>
    %cst_44 = arith.constant 3.200000e+01 : f32
    %116 = vector.broadcast %cst_44 : f32 to vector<16x1xf32>
    %117 = arith.divf %115, %116 : vector<16x1xf32>
    %cst_45 = arith.constant 9.99999996E-13 : f32
    %118 = vector.broadcast %cst_45 : f32 to vector<16x1xf32>
    %119 = arith.addf %117, %118 : vector<16x1xf32>
    %120 = math.rsqrt %119 : vector<16x1xf32>
    %121 = vector.broadcast %120 : vector<16x1xf32> to vector<16x32xf32>
    %122 = arith.mulf %112, %121 : vector<16x32xf32>
    %c0_46 = arith.constant 0 : index
    %c0_47 = arith.constant 0 : index
    %123 = vector.load %arg6[%c0_46, %c0_47] : memref<1x32xf32, #tpu.memory_space<vmem>>, vector<1x32xf32>
    %124 = vector.broadcast %123 : vector<1x32xf32> to vector<16x32xf32>
    %125 = arith.mulf %124, %122 : vector<16x32xf32>
    %c0_48 = arith.constant 0 : index
    %c0_49 = arith.constant 0 : index
    %126 = vector.load %arg7[%c0_48, %c0_49] : memref<1x32xf32, #tpu.memory_space<vmem>>, vector<1x32xf32>
    %127 = vector.broadcast %126 : vector<1x32xf32> to vector<16x32xf32>
    %128 = arith.addf %125, %127 : vector<16x32xf32>
    %c0_50 = arith.constant 0 : index
    %c0_51 = arith.constant 0 : index
    %129 = vector.load %arg8[%c0_50, %c0_51] : memref<16x32xf32, #tpu.memory_space<vmem>>, vector<16x32xf32>
    tpu.vector_store %arg8[%c0_50, %c0_51], %128 {strides = array<i32>} : memref<16x32xf32, #tpu.memory_space<vmem>>, vector<16x32xf32>,
    return
  }
  func.func @transform_0(%arg0: i32) -> (i32, i32) {
    %c0_i32 = arith.constant 0 : i32
    %c0_i32_0 = arith.constant 0 : i32
    return %arg0, %c0_i32 : i32, i32
  }
  func.func @transform_1(%arg0: i32) -> (i32, i32) {
    %c0_i32 = arith.constant 0 : i32
    %c0_i32_0 = arith.constant 0 : i32
    %c0_i32_1 = arith.constant 0 : i32
    return %c0_i32, %c0_i32_0 : i32, i32
  }
  func.func @transform_2(%arg0: i32) -> (i32, i32) {
    %c0_i32 = arith.constant 0 : i32
    %c0_i32_0 = arith.constant 0 : i32
    %c0_i32_1 = arith.constant 0 : i32
    return %c0_i32, %c0_i32_0 : i32, i32
  }
  func.func @transform_3(%arg0: i32) -> (i32, i32, i32) {
    %c0_i32 = arith.constant 0 : i32
    %c0_i32_0 = arith.constant 0 : i32
    %c0_i32_1 = arith.constant 0 : i32
    %c0_i32_2 = arith.constant 0 : i32
    return %c0_i32, %c0_i32_0, %c0_i32_1 : i32, i32, i32
  }
  func.func @transform_4(%arg0: i32) -> (i32, i32) {
    %c0_i32 = arith.constant 0 : i32
    %c0_i32_0 = arith.constant 0 : i32
    %c0_i32_1 = arith.constant 0 : i32
    return %c0_i32, %c0_i32_0 : i32, i32
  }
  func.func @transform_5(%arg0: i32) -> (i32, i32) {
    %c0_i32 = arith.constant 0 : i32
    %c0_i32_0 = arith.constant 0 : i32
    %c0_i32_1 = arith.constant 0 : i32
    return %c0_i32, %c0_i32_0 : i32, i32
  }
  func.func @transform_6(%arg0: i32) -> (i32, i32) {
    %c0_i32 = arith.constant 0 : i32
    %c0_i32_0 = arith.constant 0 : i32
    %c0_i32_1 = arith.constant 0 : i32
    return %c0_i32, %c0_i32_0 : i32, i32
  }
  func.func @transform_7(%arg0: i32) -> (i32, i32) {
    %c0_i32 = arith.constant 0 : i32
    %c0_i32_0 = arith.constant 0 : i32
    return %arg0, %c0_i32 : i32, i32
  }
}

</mosaic_0001>

<bundles_post_ra>
// kernel: tpu_custom_call.1
= control target key start
LH: loop header
LB: loop body
LE: loop exit
PB: predicated region body
PF: predicated region fallthrough
CT: control target
= control target key end

     0   :  { %12 = vsyncpa [#allocation3], 0  ;;  %s2496_s0 = inlined_call_operand.hbm [shape: f32[16,32], index: 0, kind: input, shape index: {}]   ;;  %s2497_s1 = inlined_call_operand.hbm [shape: f32[32,96], index: 1, kind: input, shape index: {}]   ;;  %s2498_s2 = inlined_call_operand.vmem [shape: f32[1,96], index: 2, kind: input, shape index: {}]   ;;  %s2499_s3 = inlined_call_operand.hbm [shape: f32[4,8,32], index: 3, kind: input, shape index: {}]   ;;  %s2500_s4 = inlined_call_operand.vmem [shape: f32[1,32], index: 4, kind: input, shape index: {}]   ;;  %s2501_s5 = inlined_call_operand.vmem [shape: f32[1,32], index: 5, kind: input, shape index: {}]   ;;  %s2502_s6 = inlined_call_operand.vmem [shape: f32[1,32], index: 6, kind: input, shape index: {}]   ;;  %s2503_s7 = inlined_call_operand.hbm [shape: f32[16,32], index: 7, kind: output, shape index: {}]  }
   0x1   :  { %13 = vsyncpa [#allocation6], 0 }
   0x2   :  { %14 = vsyncpa [#allocation4], 0  ;;  %s2257_s24 = smov [#allocation5]   ;;  %s2258_s26 = smov [#allocation2]  }
   0x3   :  { %s32_s25 = sshll.u32 %s2257_s24, 4  ;;  %s20_s27 = sshll.u32 %s2258_s26, 4  ;;  %s33_s25 = int_to_ptr.vmem [resolvable:$true] %s32_s25  ;;  %s21_s27 = int_to_ptr.vmem [resolvable:$true] %s20_s27 }
   0x4   :  { %s2179_s28 = scalar_lea.vmem %s33_s25, 512  ;;  %p2184_p1 = scmp.lt.s32.totalorder %s33_s25, %s33_s25 }
   0x5   :  { %p2180_p0 = scmp.ne.s32.totalorder %s33_s25, %s2179_s28  ;;  %p2185_p2 = scmp.lt.s32.totalorder %s2179_s28, %s2179_s28 }
   0x7   :  { %p2186_p3 = por %p2185_p2, %p2184_p1 }
   0x9   :  { %p2187_p4 = pnand %p2186_p3, %p2180_p0 }
   0xb   :  { %2190 = shalt.err (!%p2187_p4)
}
   0xc   :  { %s2259_s29 = smov 128   ;;  %s2260_s30 = smov 8  }
   0xd   :  { %38 = dma.hbm_to_vmem [thread:$0]  %s2497_s1, 512, %s33_s25, [#allocation6], %s2259_s29, %s2259_s29, %s2260_s30  }
   0xe   :  { %s2199_s10 = scalar_lea.vmem %s21_s27, 256  ;;  %p2204_p6 = scmp.lt.s32.totalorder %s21_s27, %s21_s27 }
   0xf   :  { %p2200_p5 = scmp.ne.s32.totalorder %s21_s27, %s2199_s10  ;;  %p2205_p7 = scmp.lt.s32.totalorder %s2199_s10, %s2199_s10 }
  0x11   :  { %p2206_p8 = por %p2205_p7, %p2204_p6 }
  0x13   :  { %p2207_p9 = pnand %p2206_p8, %p2200_p5 }
  0x15   :  { %2210 = shalt.err (!%p2207_p9)
}
  0x16   :  { %26 = dma.hbm_to_vmem [thread:$0]  %s2496_s0, 256, %s21_s27, [#allocation3], %s2259_s29, %s2259_s29, %s2260_s30  }
  0x17   :  { %s2261_s13 = smov [#allocation7]  }
  0x18   :  { %s46_s14 = sshll.u32 %s2261_s13, 4  ;;  %s47_s14 = int_to_ptr.vmem [resolvable:$true] %s46_s14 }
  0x19   :  { %s2219_s15 = scalar_lea.vmem %s47_s14, 512  ;;  %p2224_p11 = scmp.lt.s32.totalorder %s47_s14, %s47_s14 }
  0x1a   :  { %p2220_p10 = scmp.ne.s32.totalorder %s47_s14, %s2219_s15  ;;  %p2225_p12 = scmp.lt.s32.totalorder %s2219_s15, %s2219_s15 }
  0x1c   :  { %p2226_p13 = por %p2225_p12, %p2224_p11 }
  0x1e   :  { %p2227_p0 = pnand %p2226_p13, %p2220_p10 }
  0x20   :  { %2230 = shalt.err (!%p2227_p0)
}
  0x21   :  { %52 = dma.hbm_to_vmem [thread:$0]  %s2499_s3, 512, %s47_s14, [#allocation6], %s2259_s29, %s2259_s29, %s2260_s30  }
  0x22   :  { %2251 = dma.done.wait [#allocation3], 256  }
  0x23   :  { %2252 = vsyncadd [#allocation3], 4294967040 }
  0x24   :  { %2253 = dma.done.wait [#allocation6], 1024  }
  0x25   :  { %2254 = vsyncadd [#allocation6], 4294966272  ;;  %vm81_vm0 = vcmask 261120   ;;  %v73_v0 = vld [vmem:[#allocation5 + $0x18] sm:$0xff]  ;;  %v72_v1 = vld [vmem:[#allocation5 + $0x10] sm:$0xff]  ;;  %v2262_v6 = vmov 0.0  }
  0x26   :  { %2005 = vmatprep.subr.mxu0 %v73_v0  ;;  %v68_v2 = vld [vmem:[#allocation2] sm:$0xff]  ;;  %v71_v3 = vld [vmem:[#allocation5 + $0x8] sm:$0xff]  ;;  %v70_v4 = vld [vmem:[#allocation5] sm:$0xff]  ;;  %2016 = vmatprep.subr.mxu1 %v2262_v6  ;;  %vm2263_vm1 = vmmov 0   ;;  %s2264_s17 = smov 96   ;;  %vm168_vm2 = vcmask 64512  }
  0x27   :  { %2006 = vmatpush3.msra.mxu0 %v73_v0  ;;  %2013 = vmatprep.mubr.msk.f32.mxu0 %vm81_vm0, %v68_v2  ;;  %v69_v5 = vld [vmem:[#allocation2 + $0x8] sm:$0xff]  ;;  %v1917_v8 = vld [vmem:[%s2498_s2] ss:$0 sm:$0xff]  ;;  %s2265_s2 = smov 64   ;;  %s2266_s18 = smov 88  }
  0x28   :  { %2007 = vmatprep.subr.mxu0 %v72_v1  ;;  %2018 = vmatprep.mubr.msk.f32.mxu1 %vm2263_vm1, %v2262_v6  ;;  %s2267_s19 = smov 120   ;;  %s2268_s20 = smov 56  }
  0x29   :  { %2008 = vmatpush3.msra.mxu0 %v72_v1  ;;  %s2269_s21 = smov 112   ;;  %s2270_s22 = smov 80  }
  0x2a   :  { %2009 = vmatprep.subr.mxu0 %v71_v3  ;;  %s2271_s23 = smov 48   ;;  %s2272_s24 = smov 72  }
  0x2b   :  { %2010 = vmatpush3.msra.mxu0 %v71_v3  ;;  %s2273_s25 = smov 104   ;;  %s2274_s26 = smov 40  }
  0x2c   :  { %2011 = vmatprep.subr.mxu0 %v70_v4  ;;  %s2275_s11 = smov [#allocation8]  }
  0x2d   :  { %2012 = vmatpush3.msra.mxu0 %v70_v4  ;;  %s1904_s12 = sshll.u32 %s2275_s11, 4  ;;  %s1905_s12 = int_to_ptr.vmem [resolvable:$true] %s1904_s12 }
  0x2e   :  { %2014 = vmatmul.mubr.msk.f32.vlgmr.msra.gmra.mxu0 %vm81_vm0, %v69_v5  ;;  %2026 = vmatprep.subr.mxu0 %v2262_v6  ;;  %s2231_s13 = scalar_lea.vmem %s1905_s12, 256  ;;  %p2236_p2 = scmp.lt.s32.totalorder %s1905_s12, %s1905_s12 }
  0x2f   :  { %2028 = vmatprep.mubr.msk.f32.mxu0 %vm2263_vm1, %v2262_v6  ;;  %p2232_p1 = scmp.ne.s32.totalorder %s1905_s12, %s2231_s13  ;;  %p2237_p3 = scmp.lt.s32.totalorder %s2231_s13, %s2231_s13 }
  0x31   :  { %p2238_p4 = por %p2237_p3, %p2236_p2 }
  0x33   :  { %p2239_p5 = pnand %p2238_p4, %p2232_p1 }
  0xee   :  { %v2015_v7 = vpop.f32.mrf.mxu0 }
  0xef   :  { %v160_v11 = vadd.f32 %v2015_v7, %v1917_v8 }
  0xf0   :  { %v154_v9 = vpop.f32.mrf.mxu0 }
  0xf1   :  { %v155_v10 = vadd.f32 %v1917_v8, %v154_v9  ;;  %v2348_v13 = vmax.f32 %v160_v11, 0.0  ;;  %v500_v8 = vld [vmem:[#allocation7] sm:$0xff] }
  0xf3   :  { %v2345_v12 = vmax.f32 %v155_v10, 0.0 }
  0xf5   :  { %166 = vrot.lane.b32.xlu0 %v2345_v12, %s2264_s17 }
  0xf9   :  { %244 = vrot.lane.b32.xlu0 %v2348_v13, %s2264_s17 }
 0x167   :  { %v167_v14 = vpop.permute.xlu0 %166 }
 0x168   :  { %2017 = vmatpush3.xpose.msk.msra.mxu1 %vm168_vm2, %v167_v14 }
 0x169   :  { %2021 = vmatprep.subr.mxu1 %v2262_v6 }
 0x16b   :  { %2019 = vmatmul.mubr.msk.f32.vlgmr.msra.gmra.mxu1 %vm168_vm2, %v2345_v12  ;;  %v245_v15 = vpop.permute.xlu0 %244 }
 0x16c   :  { %2022 = vmatpush3.xpose.msk.msra.mxu1 %vm168_vm2, %v245_v15  ;;  %2023 = vmatprep.mubr.msk.f32.mxu1 %vm2263_vm1, %v2262_v6 }
 0x16d   :  { %2031 = vmatprep.subr.mxu1 %v2262_v6 }
 0x16f   :  { %2024 = vmatmul.mubr.msk.f32.vlgmr.msra.gmra.mxu1 %vm168_vm2, %v2348_v13 }
 0x170   :  { %2033 = vmatprep.mubr.msk.f32.mxu1 %vm2263_vm1, %v2262_v6 }
 0x22b   :  { %v239_v16 = vpop.f32.mrf.mxu1 }
 0x22c   :  { %v320_v17 = vsel %vm168_vm2, %v239_v16, -inf }
 0x22d   :  { %321 = vmax.xlane.f32.xlu1 %v320_v17  ;;  %v2020_v18 = vpop.f32.mrf.mxu1 }
 0x22f   :  { %v316_v19 = vpop.f32.mrf.mxu1 }
 0x230   :  { %v323_v20 = vsel %vm168_vm2, %v316_v19, -inf }
 0x231   :  { %324 = vmax.xlane.f32.xlu1 %v323_v20  ;;  %v2025_v21 = vpop.f32.mrf.mxu1 }
 0x242   :  { %348 = vrot.lane.b32.xlu1 %v2345_v12, %s2265_s2 }
 0x246   :  { %424 = vrot.lane.b32.xlu1 %v2348_v13, %s2265_s2 }
 0x24a   :  { %503 = vrot.lane.b32.xlu1 %v2345_v12, %s2266_s18 }
 0x2b6   :  { %v322_v22 = vpop.xlane.xlu1 %321 }
 0x2b7   :  { %v326_v23 = vsub.f32 %v239_v16, %v322_v22 }
 0x2b9   :  { %v328_v24 = vmul.f32 1.442695, %v326_v23 }
 0x2ba   :  { %v325_v25 = vpop.xlane.xlu1 %324 }
 0x2bb   :  { %2135 = vpow2.f32 %v328_v24  ;;  %v327_v26 = vsub.f32 %v316_v19, %v325_v25 }
 0x2bd   :  { %v330_v27 = vmul.f32 1.442695, %v327_v26 }
 0x2be   :  { %v349_v28 = vpop.permute.xlu1 %348 }
 0x2bf   :  { %2137 = vpow2.f32 %v330_v27  ;;  %2027 = vmatpush3.msra.mxu0 %v349_v28  ;;  %v838_v27 = vld [vmem:[#allocation7 + $0x8] sm:$0xff] }
 0x2c0   :  { %2036 = vmatprep.subr.mxu0 %v2262_v6 }
 0x2c2   :  { %v425_v29 = vpop.permute.xlu1 %424 }
 0x2c3   :  { %2032 = vmatpush3.msra.mxu1 %v425_v29 }
 0x2c4   :  { %2041 = vmatprep.subr.mxu1 %v2262_v6 }
 0x2c6   :  { %v504_v34 = vpop.permute.xlu1 %503 }
 0x2c8   :  { %v2136_v30 = vpop.eup %2135 }
 0x2c9   :  { %v332_v31 = vsel %vm168_vm2, %v2136_v30, 0.0 }
 0x2ca   :  { %333 = vadd.xlane.f32.xlu0 %v332_v31 }
 0x2cc   :  { %v2138_v32 = vpop.eup %2137 }
 0x2cd   :  { %v335_v33 = vsel %vm168_vm2, %v2138_v32, 0.0 }
 0x2ce   :  { %336 = vadd.xlane.f32.xlu1 %v335_v33 }
 0x2df   :  { %581 = vrot.lane.b32.xlu1 %v2348_v13, %s2266_s18 }
 0x2e0   :  { %501 = vrot.lane.b32.xlu0 %v2345_v12, %s2267_s19 }
 0x2e3   :  { %579 = vrot.lane.b32.xlu1 %v2348_v13, %s2267_s19 }
 0x353   :  { %v334_v35 = vpop.xlane.xlu0 %333 }
 0x354   :  { %2139 = vrcp.f32 %v334_v35 }
 0x357   :  { %v337_v36 = vpop.xlane.xlu1 %336  ;;  %v502_v48 = vpop.permute.xlu0 %501 }
 0x358   :  { %2141 = vrcp.f32 %v337_v36 }
 0x35b   :  { %v582_v46 = vpop.permute.xlu1 %581 }
 0x35f   :  { %v580_v49 = vpop.permute.xlu1 %579 }
 0x361   :  { %v2140_v37 = vpop.eup %2139 }
 0x362   :  { %v340_v38 = vmul.f32 %v2140_v37, %v334_v35 }
 0x364   :  { %v342_v39 = vsub.f32 2.0, %v340_v38 }
 0x365   :  { %v2142_v40 = vpop.eup %2141 }
 0x366   :  { %v344_v41 = vmul.f32 %v2140_v37, %v342_v39  ;;  %v341_v42 = vmul.f32 %v2142_v40, %v337_v36 }
 0x368   :  { %v346_v43 = vmul.f32 %v2136_v30, %v344_v41  ;;  %v343_v44 = vsub.f32 2.0, %v341_v42 }
 0x36a   :  { %v345_v45 = vmul.f32 %v2142_v40, %v343_v44  ;;  %2029 = vmatmul.mubr.msk.f32.vlgmr.msra.gmra.mxu0 %vm168_vm2, %v346_v43 }
 0x36b   :  { %2037 = vmatpush3.xpose.msk.msra.mxu0 %vm168_vm2, %v504_v34  ;;  %2038 = vmatprep.mubr.msk.f32.mxu0 %vm2263_vm1, %v2262_v6 }
 0x36c   :  { %v347_v47 = vmul.f32 %v2138_v32, %v345_v45  ;;  %2046 = vmatprep.subr.mxu0 %v2262_v6 }
 0x36e   :  { %2034 = vmatmul.mubr.msk.f32.vlgmr.msra.gmra.mxu1 %vm168_vm2, %v347_v47  ;;  %2039 = vmatmul.mubr.msk.f32.vlgmr.msra.gmra.mxu0 %vm168_vm2, %v502_v48 }
 0x36f   :  { %2042 = vmatpush3.xpose.msk.msra.mxu1 %vm168_vm2, %v582_v46  ;;  %2043 = vmatprep.mubr.msk.f32.mxu1 %vm2263_vm1, %v2262_v6 }
 0x370   :  { %2051 = vmatprep.subr.mxu1 %v2262_v6  ;;  %2048 = vmatprep.mubr.msk.f32.mxu0 %vm2263_vm1, %v2262_v6 }
 0x372   :  { %2044 = vmatmul.mubr.msk.f32.vlgmr.msra.gmra.mxu1 %vm168_vm2, %v580_v49 }
 0x373   :  { %2053 = vmatprep.mubr.msk.f32.mxu1 %vm2263_vm1, %v2262_v6 }
 0x42a   :  { %v420_v50 = vpop.f32.mrf.mxu0 }
 0x42c   :  { %v2030_v51 = vpop.f32.mrf.mxu0 }
 0x42e   :  { %v496_v52 = vpop.f32.mrf.mxu1  ;;  %v575_v53 = vpop.f32.mrf.mxu0 }
 0x42f   :  { %v657_v54 = vsel %vm168_vm2, %v575_v53, -inf }
 0x430   :  { %v2035_v55 = vpop.f32.mrf.mxu1  ;;  %658 = vmax.xlane.f32.xlu1 %v657_v54  ;;  %v2040_v56 = vpop.f32.mrf.mxu0 }
 0x432   :  { %v653_v57 = vpop.f32.mrf.mxu1 }
 0x433   :  { %v660_v58 = vsel %vm168_vm2, %v653_v57, -inf }
 0x434   :  { %661 = vmax.xlane.f32.xlu0 %v660_v58  ;;  %v2045_v59 = vpop.f32.mrf.mxu1 }
 0x44a   :  { %761 = vrot.lane.b32.xlu0 %v2348_v13, %s2268_s20 }
 0x44e   :  { %1001 = vrot.lane.b32.xlu0 %v2345_v12, %s2269_s21 }
 0x4b9   :  { %v659_v60 = vpop.xlane.xlu1 %658 }
 0x4ba   :  { %v663_v61 = vsub.f32 %v575_v53, %v659_v60 }
 0x4bc   :  { %v665_v62 = vmul.f32 1.442695, %v663_v61 }
 0x4bd   :  { %v662_v63 = vpop.xlane.xlu0 %661 }
 0x4be   :  { %2143 = vpow2.f32 %v665_v62  ;;  %v664_v0 = vsub.f32 %v653_v57, %v662_v63 }
 0x4c0   :  { %v667_v1 = vmul.f32 1.442695, %v664_v0 }
 0x4c1   :  { %v762_v2 = vpop.permute.xlu0 %761 }
 0x4c2   :  { %2145 = vpow2.f32 %v667_v1  ;;  %2052 = vmatpush3.msra.mxu1 %v762_v2 }
 0x4c3   :  { %2061 = vmatprep.subr.mxu1 %v500_v8 }
 0x4c5   :  { %v1002_v32 = vpop.permute.xlu0 %1001 }
 0x4cb   :  { %v2144_v3 = vpop.eup %2143 }
 0x4cc   :  { %v669_v4 = vsel %vm168_vm2, %v2144_v3, 0.0 }
 0x4cd   :  { %670 = vadd.xlane.f32.xlu1 %v669_v4 }
 0x4cf   :  { %v2146_v5 = vpop.eup %2145 }
 0x4d0   :  { %v672_v7 = vsel %vm168_vm2, %v2146_v5, 0.0 }
 0x4d1   :  { %673 = vadd.xlane.f32.xlu1 %v672_v7 }
 0x4e2   :  { %685 = vrot.lane.b32.xlu1 %v2345_v12, %s2268_s20 }
 0x4e6   :  { %1003 = vrot.lane.b32.xlu1 %v2345_v12, %s2270_s22 }
 0x4ea   :  { %1081 = vrot.lane.b32.xlu1 %v2348_v13, %s2270_s22 }
 0x4ee   :  { %1079 = vrot.lane.b32.xlu1 %v2348_v13, %s2269_s21 }
 0x556   :  { %v671_v9 = vpop.xlane.xlu1 %670 }
 0x557   :  { %2147 = vrcp.f32 %v671_v9 }
 0x55a   :  { %v674_v10 = vpop.xlane.xlu1 %673 }
 0x55b   :  { %2149 = vrcp.f32 %v674_v10 }
 0x55e   :  { %v686_v11 = vpop.permute.xlu1 %685 }
 0x55f   :  { %2047 = vmatpush3.msra.mxu0 %v686_v11 }
 0x560   :  { %2056 = vmatprep.subr.mxu0 %v838_v27 }
 0x562   :  { %v1004_v22 = vpop.permute.xlu1 %1003 }
 0x564   :  { %v2148_v14 = vpop.eup %2147 }
 0x565   :  { %v677_v15 = vmul.f32 %v2148_v14, %v671_v9 }
 0x566   :  { %v1082_v25 = vpop.permute.xlu1 %1081 }
 0x567   :  { %v679_v16 = vsub.f32 2.0, %v677_v15 }
 0x568   :  { %v2150_v17 = vpop.eup %2149 }
 0x569   :  { %v681_v18 = vmul.f32 %v2148_v14, %v679_v16  ;;  %v678_v19 = vmul.f32 %v2150_v17, %v674_v10 }
 0x56a   :  { %v1080_v26 = vpop.permute.xlu1 %1079 }
 0x56b   :  { %v683_v20 = vmul.f32 %v2144_v3, %v681_v18  ;;  %v680_v21 = vsub.f32 2.0, %v678_v19 }
 0x56d   :  { %v682_v23 = vmul.f32 %v2150_v17, %v680_v21  ;;  %2049 = vmatmul.mubr.msk.f32.vlgmr.msra.gmra.mxu0 %vm168_vm2, %v683_v20 }
 0x56e   :  { %2057 = vmatpush3.msra.mxu0 %v838_v27 }
 0x56f   :  { %v684_v24 = vmul.f32 %v2146_v5, %v682_v23  ;;  %2066 = vmatprep.subr.mxu0 %v2262_v6  ;;  %v1338_v5 = vld [vmem:[#allocation7 + $0x10] sm:$0xff] }
 0x571   :  { %2054 = vmatmul.mubr.msk.f32.vlgmr.msra.gmra.mxu1 %vm168_vm2, %v684_v24 }
 0x572   :  { %2063 = vmatprep.mubr.msk.f32.mxu1 %vm168_vm2, %v420_v50  ;;  %2062 = vmatpush3.msra.mxu1 %v500_v8 }
 0x573   :  { %2071 = vmatprep.subr.mxu1 %v2262_v6 }
 0x575   :  { %2064 = vmatmul.mubr.msk.f32.vlgmr.msra.gmra.mxu1 %vm168_vm2, %v496_v52 }
 0x576   :  { %2072 = vmatpush3.xpose.msk.msra.mxu1 %vm168_vm2, %v1082_v25  ;;  %2073 = vmatprep.mubr.msk.f32.mxu1 %vm2263_vm1, %v2262_v6 }
 0x577   :  { %2081 = vmatprep.subr.mxu1 %v2262_v6 }
 0x579   :  { %2074 = vmatmul.mubr.msk.f32.vlgmr.msra.gmra.mxu1 %vm168_vm2, %v1080_v26 }
 0x57a   :  { %2083 = vmatprep.mubr.msk.f32.mxu1 %vm2263_vm1, %v2262_v6 }
 0x62d   :  { %v757_v28 = vpop.f32.mrf.mxu0 }
 0x62e   :  { %2058 = vmatprep.mubr.msk.f32.mxu0 %vm168_vm2, %v757_v28 }
 0x62f   :  { %v2050_v29 = vpop.f32.mrf.mxu0 }
 0x631   :  { %v833_v30 = vpop.f32.mrf.mxu1 }
 0x632   :  { %2059 = vmatmul.mubr.msk.f32.vlgmr.msra.gmra.mxu0 %vm168_vm2, %v833_v30 }
 0x633   :  { %2067 = vmatpush3.xpose.msk.msra.mxu0 %vm168_vm2, %v1004_v22  ;;  %v2055_v31 = vpop.f32.mrf.mxu1  ;;  %2068 = vmatprep.mubr.msk.f32.mxu0 %vm2263_vm1, %v2262_v6 }
 0x634   :  { %2076 = vmatprep.subr.mxu0 %v2262_v6 }
 0x635   :  { %v2420_v33 = vpop.f32.mrf.mxu1 }
 0x636   :  { %2069 = vmatmul.mubr.msk.f32.vlgmr.msra.gmra.mxu0 %vm168_vm2, %v1002_v32 }
 0x637   :  { %v2423_v34 = vpop.f32.mrf.mxu1  ;;  %2078 = vmatprep.mubr.msk.f32.mxu0 %vm2263_vm1, %v2262_v6 }
 0x639   :  { %v1153_v35 = vpop.f32.mrf.mxu1 }
 0x63a   :  { %v1160_v36 = vsel %vm168_vm2, %v1153_v35, -inf }
 0x63b   :  { %1161 = vmax.xlane.f32.xlu1 %v1160_v36  ;;  %v2075_v37 = vpop.f32.mrf.mxu1 }
 0x64c   :  { %1185 = vrot.lane.b32.xlu1 %v2345_v12, %s2271_s23 }
 0x650   :  { %1424 = vrot.lane.b32.xlu1 %v2345_v12, %s2272_s24 }
 0x654   :  { %1502 = vrot.lane.b32.xlu1 %v2348_v13, %s2272_s24 }
 0x658   :  { %1500 = vrot.lane.b32.xlu1 %v2348_v13, %s2273_s25 }
 0x6c4   :  { %v1162_v38 = vpop.xlane.xlu1 %1161 }
 0x6c5   :  { %v1164_v45 = vsub.f32 %v1153_v35, %v1162_v38 }
 0x6c7   :  { %v1167_v48 = vmul.f32 1.442695, %v1164_v45 }
 0x6c8   :  { %v1186_v39 = vpop.permute.xlu1 %1185 }
 0x6c9   :  { %2077 = vmatpush3.msra.mxu0 %v1186_v39 }
 0x6ca   :  { %2086 = vmatprep.subr.mxu0 %v1338_v5 }
 0x6cc   :  { %v1425_v3 = vpop.permute.xlu1 %1424 }
 0x6d0   :  { %v1503_v8 = vpop.permute.xlu1 %1502 }
 0x6d4   :  { %v1501_v14 = vpop.permute.xlu1 %1500 }
 0x6f2   :  { %v2432_v40 = vpop.f32.mrf.mxu0 }
 0x6f3   :  { %v998_v23 = vadd.f32 %v2420_v33, %v2432_v40 }
 0x6f4   :  { %v2434_v41 = vpop.f32.mrf.mxu0 }
 0x6f5   :  { %v993_v25 = vadd.f32 %v2423_v34, %v2434_v41 }
 0x6f6   :  { %v1075_v42 = vpop.f32.mrf.mxu0 }
 0x6f7   :  { %v1157_v43 = vsel %vm168_vm2, %v1075_v42, -inf }
 0x6f8   :  { %1158 = vmax.xlane.f32.xlu0 %v1157_v43  ;;  %v2070_v44 = vpop.f32.mrf.mxu0 }
 0x781   :  { %v1159_v46 = vpop.xlane.xlu0 %1158 }
 0x782   :  { %v1163_v47 = vsub.f32 %v1075_v42, %v1159_v46 }
 0x784   :  { %v1165_v49 = vmul.f32 1.442695, %v1163_v47 }
 0x786   :  { %2151 = vpow2.f32 %v1165_v49 }
 0x787   :  { %2153 = vpow2.f32 %v1167_v48 }
 0x793   :  { %v2152_v50 = vpop.eup %2151 }
 0x794   :  { %v1169_v51 = vsel %vm168_vm2, %v2152_v50, 0.0  ;;  %v2154_v52 = vpop.eup %2153 }
 0x795   :  { %1170 = vadd.xlane.f32.xlu0 %v1169_v51  ;;  %v1172_v53 = vsel %vm168_vm2, %v2154_v52, 0.0 }
 0x799   :  { %1173 = vadd.xlane.f32.xlu0 %v1172_v53 }
 0x7af   :  { %1261 = vrot.lane.b32.xlu0 %v2348_v13, %s2271_s23 }
 0x7b3   :  { %1422 = vrot.lane.b32.xlu0 %v2345_v12, %s2273_s25 }
 0x81e   :  { %v1171_v54 = vpop.xlane.xlu0 %1170 }
 0x81f   :  { %2155 = vrcp.f32 %v1171_v54 }
 0x822   :  { %v1174_v55 = vpop.xlane.xlu0 %1173 }
 0x823   :  { %2157 = vrcp.f32 %v1174_v55 }
 0x826   :  { %v1262_v56 = vpop.permute.xlu0 %1261 }
 0x827   :  { %2082 = vmatpush3.msra.mxu1 %v1262_v56 }
 0x828   :  { %2091 = vmatprep.subr.mxu1 %v2262_v6 }
 0x82a   :  { %v1423_v4 = vpop.permute.xlu0 %1422 }
 0x82c   :  { %v2156_v57 = vpop.eup %2155 }
 0x82d   :  { %v1177_v58 = vmul.f32 %v2156_v57, %v1171_v54  ;;  %v1952_v54 = vld [vmem:[%s2500_s4] ss:$0 sm:$0xff] }
 0x82f   :  { %v1179_v59 = vsub.f32 2.0, %v1177_v58 }
 0x830   :  { %v2158_v60 = vpop.eup %2157 }
 0x831   :  { %v1181_v61 = vmul.f32 %v2156_v57, %v1179_v59  ;;  %v1178_v62 = vmul.f32 %v2158_v60, %v1174_v55 }
 0x833   :  { %v1183_v63 = vmul.f32 %v2152_v50, %v1181_v61  ;;  %v1180_v0 = vsub.f32 2.0, %v1178_v62 }
 0x835   :  { %v1182_v1 = vmul.f32 %v2158_v60, %v1180_v0  ;;  %2079 = vmatmul.mubr.msk.f32.vlgmr.msra.gmra.mxu0 %vm168_vm2, %v1183_v63 }
 0x836   :  { %2087 = vmatpush3.msra.mxu0 %v1338_v5 }
 0x837   :  { %v1184_v2 = vmul.f32 %v2154_v52, %v1182_v1  ;;  %2096 = vmatprep.subr.mxu0 %v2262_v6 }
 0x839   :  { %2084 = vmatmul.mubr.msk.f32.vlgmr.msra.gmra.mxu1 %vm168_vm2, %v1184_v2 }
 0x83a   :  { %2092 = vmatpush3.xpose.msk.msra.mxu1 %vm168_vm2, %v1425_v3  ;;  %2093 = vmatprep.mubr.msk.f32.mxu1 %vm2263_vm1, %v2262_v6 }
 0x83b   :  { %2101 = vmatprep.subr.mxu1 %v2262_v6 }
 0x83d   :  { %2094 = vmatmul.mubr.msk.f32.vlgmr.msra.gmra.mxu1 %vm168_vm2, %v1423_v4 }
 0x83e   :  { %2103 = vmatprep.mubr.msk.f32.mxu1 %vm2263_vm1, %v2262_v6 }
 0x8f5   :  { %v1257_v7 = vpop.f32.mrf.mxu0 }
 0x8f6   :  { %2088 = vmatprep.mubr.msk.f32.mxu0 %vm168_vm2, %v1257_v7 }
 0x8f7   :  { %v2080_v9 = vpop.f32.mrf.mxu0 }
 0x8f9   :  { %v1333_v10 = vpop.f32.mrf.mxu1 }
 0x8fa   :  { %2089 = vmatmul.mubr.msk.f32.vlgmr.msra.gmra.mxu0 %vm168_vm2, %v1333_v10 }
 0x8fb   :  { %2097 = vmatpush3.xpose.msk.msra.mxu0 %vm168_vm2, %v1503_v8  ;;  %v2085_v11 = vpop.f32.mrf.mxu1  ;;  %2098 = vmatprep.mubr.msk.f32.mxu0 %vm2263_vm1, %v2262_v6 }
 0x8fc   :  { %2106 = vmatprep.subr.mxu0 %v2262_v6 }
 0x8fd   :  { %v1496_v15 = vpop.f32.mrf.mxu1 }
 0x8fe   :  { %2099 = vmatmul.mubr.msk.f32.vlgmr.msra.gmra.mxu0 %vm168_vm2, %v1501_v14  ;;  %v1578_v16 = vsel %vm168_vm2, %v1496_v15, -inf }
 0x8ff   :  { %1579 = vmax.xlane.f32.xlu0 %v1578_v16  ;;  %v2095_v17 = vpop.f32.mrf.mxu1  ;;  %2108 = vmatprep.mubr.msk.f32.mxu0 %vm2263_vm1, %v2262_v6 }
 0x988   :  { %v1580_v18 = vpop.xlane.xlu0 %1579 }
 0x989   :  { %v1584_v19 = vsub.f32 %v1496_v15, %v1580_v18  ;;  %v1953_v18 = vld [vmem:[%s2501_s5] ss:$0 sm:$0xff] }
 0x98b   :  { %v1586_v20 = vmul.f32 1.442695, %v1584_v19 }
 0x98d   :  { %2159 = vpow2.f32 %v1586_v20 }
 0x99a   :  { %v2160_v21 = vpop.eup %2159 }
 0x99b   :  { %v1590_v22 = vsel %vm168_vm2, %v2160_v21, 0.0 }
 0x99c   :  { %1591 = vadd.xlane.f32.xlu0 %v1590_v22 }
 0x9ba   :  { %v2090_v24 = vpop.f32.mrf.mxu0 }
 0x9bb   :  { %v1421_v26 = vadd.f32 %v2090_v24, %v998_v23 }
 0x9bc   :  { %v1411_v27 = vpop.f32.mrf.mxu0 }
 0x9bd   :  { %v1420_v28 = vadd.f32 %v1411_v27, %v993_v25 }
 0x9be   :  { %v1574_v29 = vpop.f32.mrf.mxu0 }
 0x9bf   :  { %v1581_v6 = vsel %vm168_vm2, %v1574_v29, -inf }
 0x9c0   :  { %1582 = vmax.xlane.f32.xlu1 %v1581_v6  ;;  %v2100_v30 = vpop.f32.mrf.mxu0 }
 0x9d1   :  { %1606 = vrot.lane.b32.xlu1 %v2345_v12, %s2274_s26  ;;  %v1759_v12 = vld [vmem:[#allocation7 + $0x18] sm:$0xff] }
 0xa25   :  { %v1592_v31 = vpop.xlane.xlu0 %1591 }
 0xa26   :  { %2161 = vrcp.f32 %v1592_v31 }
 0xa33   :  { %v2162_v32 = vpop.eup %2161 }
 0xa34   :  { %v1598_v35 = vmul.f32 %v2162_v32, %v1592_v31 }
 0xa36   :  { %v1600_v33 = vsub.f32 2.0, %v1598_v35 }
 0xa38   :  { %v1602_v36 = vmul.f32 %v2162_v32, %v1600_v33 }
 0xa3a   :  { %v1604_v39 = vmul.f32 %v2160_v21, %v1602_v36  ;;  %v1954_v21 = vld [vmem:[%s2502_s6] ss:$0 sm:$0xff] }
 0xa49   :  { %v1583_v37 = vpop.xlane.xlu1 %1582 }
 0xa4a   :  { %v1585_v38 = vsub.f32 %v1574_v29, %v1583_v37 }
 0xa4c   :  { %v1588_v34 = vmul.f32 1.442695, %v1585_v38 }
 0xa4d   :  { %v1607_v40 = vpop.permute.xlu1 %1606 }
 0xa4e   :  { %2163 = vpow2.f32 %v1588_v34  ;;  %2102 = vmatpush3.msra.mxu1 %v1607_v40 }
 0xa4f   :  { %2104 = vmatmul.mubr.msk.f32.vlgmr.msra.gmra.mxu1 %vm168_vm2, %v1604_v39  ;;  %2111 = vmatprep.subr.mxu1 %v1759_v12 }
 0xa50   :  { %2112 = vmatpush3.msra.mxu1 %v1759_v12 }
 0xa5b   :  { %v2164_v41 = vpop.eup %2163 }
 0xa5c   :  { %v1593_v42 = vsel %vm168_vm2, %v2164_v41, 0.0 }
 0xa5d   :  { %1594 = vadd.xlane.f32.xlu0 %v1593_v42 }
 0xa73   :  { %1682 = vrot.lane.b32.xlu0 %v2348_v13, %s2274_s26 }
 0xae6   :  { %v1595_v43 = vpop.xlane.xlu0 %1594 }
 0xae7   :  { %2165 = vrcp.f32 %v1595_v43 }
 0xaea   :  { %v1683_v44 = vpop.permute.xlu0 %1682 }
 0xaeb   :  { %2107 = vmatpush3.msra.mxu0 %v1683_v44 }
 0xaf4   :  { %v2166_v45 = vpop.eup %2165 }
 0xaf5   :  { %v1599_v46 = vmul.f32 %v2166_v45, %v1595_v43 }
 0xaf7   :  { %v1601_v47 = vsub.f32 2.0, %v1599_v46 }
 0xaf9   :  { %v1603_v48 = vmul.f32 %v2166_v45, %v1601_v47 }
 0xafb   :  { %v1605_v49 = vmul.f32 %v2164_v41, %v1603_v48 }
 0xafd   :  { %2109 = vmatmul.mubr.msk.f32.vlgmr.msra.gmra.mxu0 %vm168_vm2, %v1605_v49 }
 0xb0f   :  { %v1678_v50 = vpop.f32.mrf.mxu1 }
 0xb10   :  { %2113 = vmatprep.mubr.msk.f32.mxu1 %vm168_vm2, %v1678_v50 }
 0xb11   :  { %v2105_v51 = vpop.f32.mrf.mxu1 }
 0xbbd   :  { %v1754_v52 = vpop.f32.mrf.mxu0 }
 0xbbe   :  { %2114 = vmatmul.mubr.msk.f32.vlgmr.msra.gmra.mxu1 %vm168_vm2, %v1754_v52 }
 0xbbf   :  { %v2110_v13 = vpop.f32.mrf.mxu0 }
 0xc7e   :  { %v2115_v53 = vpop.f32.mrf.mxu1 }
 0xc7f   :  { %v1842_v55 = vadd.f32 %v2115_v53, %v1421_v26 }
 0xc80   :  { %v1832_v56 = vpop.f32.mrf.mxu1 }
 0xc81   :  { %v1841_v57 = vadd.f32 %v1832_v56, %v1420_v28  ;;  %v1851_v58 = vadd.f32 %v1952_v54, %v1842_v55 }
 0xc83   :  { %v1855_v59 = vsel %vm81_vm0, %v1851_v58, 0.0  ;;  %v1850_v60 = vadd.f32 %v1952_v54, %v1841_v57 }
 0xc84   :  { %1856 = vadd.xlane.f32.xlu0 %v1855_v59 }
 0xc85   :  { %v1852_v61 = vsel %vm81_vm0, %v1850_v60, 0.0 }
 0xc86   :  { %1853 = vadd.xlane.f32.xlu1 %v1852_v61 }
 0xd0d   :  { %v1857_v62 = vpop.xlane.xlu0 %1856 }
 0xd0e   :  { %v1860_v63 = vmul.f32 0.03125, %v1857_v62 }
 0xd0f   :  { %v1854_v0 = vpop.xlane.xlu1 %1853 }
 0xd10   :  { %v1862_v1 = vsub.f32 %v1851_v58, %v1860_v63  ;;  %v1859_v2 = vmul.f32 0.03125, %v1854_v0 }
 0xd12   :  { %v1861_v3 = vsub.f32 %v1850_v60, %v1859_v2  ;;  %v1864_v4 = vmul.f32 %v1862_v1, %v1862_v1 }
 0xd14   :  { %v1868_v5 = vsel %vm81_vm0, %v1864_v4, 0.0  ;;  %v1863_v7 = vmul.f32 %v1861_v3, %v1861_v3 }
 0xd15   :  { %1869 = vadd.xlane.f32.xlu0 %v1868_v5 }
 0xd16   :  { %v1865_v8 = vsel %vm81_vm0, %v1863_v7, 0.0 }
 0xd17   :  { %1866 = vadd.xlane.f32.xlu1 %v1865_v8 }
 0xd9e   :  { %v1870_v9 = vpop.xlane.xlu0 %1869 }
 0xd9f   :  { %v1872_v10 = vmul.f32 0.03125, %v1870_v9 }
 0xda0   :  { %v1867_v11 = vpop.xlane.xlu1 %1866 }
 0xda1   :  { %v1874_v14 = vadd.f32 1e-12, %v1872_v10  ;;  %v1871_v15 = vmul.f32 0.03125, %v1867_v11 }
 0xda3   :  { %2167 = vrsqrt.f32 %v1874_v14  ;;  %v1873_v16 = vadd.f32 1e-12, %v1871_v15 }
 0xda5   :  { %2169 = vrsqrt.f32 %v1873_v16 }
 0xdb0   :  { %v2168_v17 = vpop.eup %2167 }
 0xdb1   :  { %v1878_v19 = vmul.f32 %v2168_v17, %v1862_v1 }
 0xdb2   :  { %v2170_v20 = vpop.eup %2169 }
 0xdb3   :  { %v1877_v22 = vmul.f32 %v2170_v20, %v1861_v3  ;;  %v1887_v23 = vmul.f32 %v1953_v18, %v1878_v19 }
 0xdb5   :  { %v1886_v24 = vmul.f32 %v1953_v18, %v1877_v22  ;;  %v1896_v25 = vadd.f32 %v1954_v21, %v1887_v23 }
 0xdb7   :  { %v1895_v26 = vadd.f32 %v1954_v21, %v1886_v24  ;;  %1898 = vst.msk [vmem:[#allocation8 + $0x8] sm:$0xff] %vm81_vm0, %v1896_v25 }
 0xdb9   :  { %1897 = vst.msk [vmem:[#allocation8] sm:$0xff] %vm81_vm0, %v1895_v26 }
 0xdba   :  { %2242 = shalt.err (!%p2239_p5)
}
 0xdbb   :  { %1910 = dma.vmem_to_hbm [thread:$0]  %s1905_s12, 256, %s2503_s7, [#allocation4], %s2259_s29, %s2259_s29, %s2260_s30  }
 0xdbc   :  { %2255 = dma.done.wait [#allocation4], 256  }
 0xdbd   :  { %2256 = vsyncadd [#allocation4], 4294967040 }
 0xdbe   :  { %1914 = vsyncpa [#allocation3], 1 }
 0xdbf   :  { %1915 = vsyncpa [#allocation6], 1 }
 0xdc0   :  { %1916 = vsyncpa [#allocation4], 1 }

</bundles_post_ra>
